<compile_context>
chip_gen: v7x
topology: tpu7x:2x2x1
jax: 0.10.0
libtpu: 0.0.40
codegen_flags: <defaults>
</compile_context>

<pallas_src>
import functools
import math

import jax
import jax.numpy as jnp
from jax import lax
from jax.experimental import pallas as pl
from jax.experimental.pallas import tpu as pltpu


def _round_up(x: int, m: int) -> int:
    return ((x + m - 1) // m) * m


def _actor_critic_kernel(x_ref, w1_ref, wh_ref, out_ref, *, action_dim):
    """Fused forward: one hidden matmul + ReLU, one fused actor+critic matmul,
    masked softmax, single lane-dense store."""
    # Hidden layer.  The bias is folded into W1 via the ones lane of x, so this
    # is a single bf16 MXU dot (f32 accumulate) + ReLU.
    h = jnp.dot(x_ref[...], w1_ref[...], preferred_element_type=jnp.float32)
    h = jnp.maximum(h, 0.0)

    # Fused actor + critic head: one (Hp, OUT_P) matmul.  Lane layout of `fused`:
    #   [0, action_dim)      -> actor logits (bias baked into the ones row)
    #   action_dim           -> critic state value
    #   (action_dim, OUT_P)  -> -1e30 pre-baked in the bias row => exp -> 0,
    #                           so no in-kernel padding mask is needed.
    fused = jnp.dot(h.astype(wh_ref.dtype), wh_ref[...],
                    preferred_element_type=jnp.float32)

    lane = lax.broadcasted_iota(jnp.int32, fused.shape, 1)
    is_value = lane == action_dim                       # exclude value lane only
    logits = jnp.where(is_value, jnp.float32(-1e30), fused)
    m = jnp.max(logits, axis=-1, keepdims=True)
    e = jnp.exp(logits - m)
    denom = jnp.sum(e, axis=-1, keepdims=True)
    # approx reciprocal lives in the otherwise-idle EUP slot.  NOTE: probs then
    # sum to 1 +/- ~1e-3; renormalize / use exact divide if these ever feed an
    # exact Categorical log-prob in the train path.
    probs = e * pl.reciprocal(denom, approx=True)

    # Single lane-dense store: probs in action lanes, raw value in its lane.
    out_ref[...] = jnp.where(is_value, fused, probs).astype(out_ref.dtype)


@functools.partial(jax.jit, static_argnames=("action_dim",))
def _forward_impl(state, padded_params, *, action_dim):
    w1p, whp = padded_params
    squeeze = state.ndim == 1
    x = (state.reshape(1, -1) if squeeze else state).astype(jnp.float32)
    B, K = x.shape
    Kp, Hp = w1p.shape
    OUT_P = whp.shape[1]

    # Batch tiling: small batches -> one tile; large batches -> 256-row tiles on
    # a "parallel" grid axis (shards across both v7x TensorCores and lets the
    # x / out BlockSpec DMAs pipeline against the MXU work).
    TILE_B = min(256, _round_up(B, 16))
    Bp = _round_up(B, TILE_B)

    # Augment x with a ones lane (bias folding), zero-pad, cast to bf16 for the
    # bf16-native MXU.  Padded K lanes stay exactly zero (no NaN leakage).
    ones = jnp.ones((B, 1), jnp.float32)
    x_aug = jnp.concatenate([x, ones], axis=1)                    # (B, K+1)
    x_pad = jnp.pad(x_aug, ((0, Bp - B), (0, Kp - (K + 1)))).astype(w1p.dtype)

    kernel = functools.partial(_actor_critic_kernel, action_dim=action_dim)
    weight_map = lambda i: (0, 0)     # weights stay resident across batch tiles
    batch_map = lambda i: (i, 0)

    # VMEM budget derived from actual tile sizes (v7x only has 64 MiB physical).
    io_bytes = 2 * (TILE_B * Kp * x_pad.dtype.itemsize          # double-buffered x
                    + TILE_B * OUT_P * 4)                       # double-buffered out
    weight_bytes = 2 * (Kp * Hp + Hp * OUT_P) * w1p.dtype.itemsize
    vmem_limit = int(min(max(2 * (io_bytes + weight_bytes), 4 * 1024 * 1024),
                         48 * 1024 * 1024))

    out = pl.pallas_call(
        kernel,
        out_shape=jax.ShapeDtypeStruct((Bp, OUT_P), jnp.float32),
        grid=(Bp // TILE_B,),
        in_specs=[
            pl.BlockSpec((TILE_B, Kp), batch_map),   # x (ones-augmented, padded)
            pl.BlockSpec((Kp, Hp), weight_map),      # W1 (bias folded in)
            pl.BlockSpec((Hp, OUT_P), weight_map),   # fused actor+critic head
        ],
        out_specs=pl.BlockSpec((TILE_B, OUT_P), batch_map),
        compiler_params=pltpu.CompilerParams(
            dimension_semantics=("parallel",),
            vmem_limit_bytes=vmem_limit,
        ),
    )(x_pad, w1p, whp)

    probs = out[:B, :action_dim]
    value = out[:B, action_dim:action_dim + 1]
    action = jnp.argmax(probs, axis=-1)
    if squeeze:
        probs, value, action = probs[0], value[0], action[0]
    return action, probs, value


class ActorCriticNetPallas:
    """JAX/Pallas equivalent of ActorCriticNet.forward (actor + critic heads)."""

    def __init__(self, state_dim, action_dim, hidden_dims, key):
        # The PyTorch forward uses affine: state_dim -> hidden_dims[0] and then
        # heads with in_features = hidden_dims[-1]; these must match.
        assert hidden_dims[0] == hidden_dims[-1]
        hidden = hidden_dims[0]
        self.state_dim = state_dim
        self.action_dim = action_dim
        self.hidden = hidden

        k1, k2, k3 = jax.random.split(key, 3)
        self.w1, self.b1 = self._init_linear(k1, state_dim, hidden)
        self.wa, self.ba = self._init_linear(k2, hidden, action_dim)
        self.wv, self.bv = self._init_linear(k3, hidden, 1)

        # ---- Build the fused / padded kernel parameters (done once, at init) --
        Kp = _round_up(state_dim + 1, 128)      # +1 ones lane (hidden bias fold)
        Hp = _round_up(hidden + 1, 128)         # +1 ones lane (head bias fold)
        OUT_P = _round_up(action_dim + 1, 128)  # logits + value lane, lane-dense

        # W1_aug: rows [0, state_dim) = W1; row `state_dim` = b1 (driven by the
        # ones lane of x); a single 1.0 at [state_dim, hidden] makes the hidden
        # activation's lane `hidden` exactly 1 so the head bias folds in too.
        w1p = jnp.zeros((Kp, Hp), jnp.float32)
        w1p = w1p.at[:state_dim, :hidden].set(self.w1)
        w1p = w1p.at[state_dim, :hidden].set(self.b1[0])
        w1p = w1p.at[state_dim, hidden].set(1.0)

        # Fused head: columns [0, action_dim) = Wa, column `action_dim` = wv;
        # row `hidden` carries the concatenated biases; padded lanes
        # (> action_dim) get -1e30 in the bias row so they exp-underflow to 0
        # inside the softmax (no in-kernel padding mask needed).
        whp = jnp.zeros((Hp, OUT_P), jnp.float32)
        whp = whp.at[:hidden, :action_dim].set(self.wa)
        whp = whp.at[:hidden, action_dim].set(self.wv[:, 0])
        whp = whp.at[hidden, :action_dim].set(self.ba[0])
        whp = whp.at[hidden, action_dim].set(self.bv[0, 0])
        whp = whp.at[hidden, action_dim + 1:].set(-1e30)

        # bf16 storage halves weight DMA bytes / VMEM; the MXU is bf16-native on
        # v5e/v6e/v7x.  All accumulation / softmax math stays in f32 in-kernel.
        self.padded_params = (w1p.astype(jnp.bfloat16), whp.astype(jnp.bfloat16))

    @staticmethod
    def _init_linear(key, fan_in, fan_out):
        # PyTorch-style uniform init; weights stored (in, out) so y = x @ W + b
        # matches nn.Linear's x @ W_pt.T + b.
        wk, bk = jax.random.split(key)
        bound = 1.0 / math.sqrt(fan_in)
        w = jax.random.uniform(wk, (fan_in, fan_out), jnp.float32, -bound, bound)
        b = jax.random.uniform(bk, (1, fan_out), jnp.float32, -bound, bound)
        return w, b

    def forward(self, state, train=False):
        action, probs, value = _forward_impl(state, self.padded_params,
                                             action_dim=self.action_dim)
        if train:
            # TODO(synk): Categorical sampling, log_prob, .item(), and the
            # logprobs / state_values / rewards buffers are host-side Python
            # bookkeeping in the original module, not TPU kernel work.
            return probs, value
        return action, probs, value

    def reference_forward(self, state):
        """Pure-JAX f32 reference (same math, original unpadded weights)."""
        x = state.astype(jnp.float32)
        if x.ndim == 1:
            x = x[None]
        h = jnp.maximum(x @ self.w1 + self.b1, 0.0)
        probs = jax.nn.softmax(h @ self.wa + self.ba, axis=-1)
        value = h @ self.wv + self.bv
        return probs, value


if __name__ == "__main__":
    key = jax.random.PRNGKey(0)
    key, init_key, x_key = jax.random.split(key, 3)

    batch = 2
    state_dim = 16
    hidden_dims = [32]
    action_dim = 8

    net = ActorCriticNetPallas(state_dim, action_dim, hidden_dims, init_key)
    state = jax.random.normal(x_key, (batch, state_dim), jnp.float32)

    action, probs, value = net.forward(state, train=False)
    action, probs, value = jax.block_until_ready((action, probs, value))

    # Validate against a pure-JAX f32 reference (kernel uses bf16 weights and an
    # approx reciprocal, so tolerances are generous but still meaningful).
    ref_probs, ref_value = net.reference_forward(state)

    assert probs.shape == (batch, action_dim)
    assert value.shape == (batch, 1)
    assert action.shape == (batch,)
    assert bool(jnp.all(probs >= 0.0))
    assert bool(jnp.allclose(jnp.sum(probs, axis=-1), 1.0, atol=5e-3))
    assert bool(jnp.allclose(probs, ref_probs, rtol=5e-2, atol=1e-2))
    assert bool(jnp.allclose(value, ref_value, rtol=5e-2, atol=2e-2))
    assert bool(jnp.all(action == jnp.argmax(probs, axis=-1)))

    # Also exercise the single-state (ndim == 1) path used by the RL loop.
    a1, p1, v1 = net.forward(state[0], train=False)
    jax.block_until_ready((a1, p1, v1))
    assert p1.shape == (action_dim,) and v1.shape == (1,)

    print("KERNEL_OK")
</pallas_src>

<mosaic_0001>
module attributes {stable_mosaic.version = 11 : i64} {
  func.func @_actor_critic_kernel(%arg0: i32, %arg1: memref<16x128xbf16, #tpu.memory_space<vmem>>, %arg2: memref<128x128xbf16, #tpu.memory_space<vmem>>, %arg3: memref<128x128xbf16, #tpu.memory_space<vmem>>, %arg4: memref<16x128xf32, #tpu.memory_space<vmem>>) attributes {dimension_semantics = [#tpu.dimension_semantics<parallel>], iteration_bounds = array<i64: 1>, scalar_prefetch = 0 : i64, scratch_operands = 0 : i64, tpu.core_type = #tpu.core_type<tc>, window_params = [{transform_indices = @transform_0, window_bounds = array<i64: 16, 128>}, {pipeline_mode = #tpu.pipeline_mode<synchronous>, transform_indices = @transform_1, window_bounds = array<i64: 128, 128>}, {pipeline_mode = #tpu.pipeline_mode<synchronous>, transform_indices = @transform_2, window_bounds = array<i64: 128, 128>}, {transform_indices = @transform_3, window_bounds = array<i64: 16, 128>}]} {
    %c0 = arith.constant 0 : index
    %c0_0 = arith.constant 0 : index
    %0 = vector.load %arg1[%c0, %c0_0] : memref<16x128xbf16, #tpu.memory_space<vmem>>, vector<16x128xbf16>
    %c0_1 = arith.constant 0 : index
    %c0_2 = arith.constant 0 : index
    %1 = vector.load %arg2[%c0_1, %c0_2] : memref<128x128xbf16, #tpu.memory_space<vmem>>, vector<128x128xbf16>
    %cst = arith.constant dense<0.000000e+00> : vector<16x128xf32>
    %2 = tpu.matmul %0, %1, %cst {dimension_numbers = #tpu.dot_dimension_numbers<[1], [0], [0], [1], [0, 0, 1, 1], [], []>} : vector<16x128xbf16>, vector<128x128xbf16>, vector<16x128xf32> -> vector<16x128xf32>
    %cst_3 = arith.constant 0.000000e+00 : f32
    %3 = vector.broadcast %cst_3 : f32 to vector<16x128xf32>
    %4 = arith.maximumf %2, %3 : vector<16x128xf32>
    %5 = arith.truncf %4 : vector<16x128xf32> to vector<16x128xbf16>
    %c0_4 = arith.constant 0 : index
    %c0_5 = arith.constant 0 : index
    %6 = vector.load %arg3[%c0_4, %c0_5] : memref<128x128xbf16, #tpu.memory_space<vmem>>, vector<128x128xbf16>
    %cst_6 = arith.constant dense<0.000000e+00> : vector<16x128xf32>
    %7 = tpu.matmul %5, %6, %cst_6 {dimension_numbers = #tpu.dot_dimension_numbers<[1], [0], [0], [1], [0, 0, 1, 1], [], []>} : vector<16x128xbf16>, vector<128x128xbf16>, vector<16x128xf32> -> vector<16x128xf32>
    %8 = tpu.iota {dimensions = array<i32: 1>} : vector<16x128xi32>
    %c8_i32 = arith.constant 8 : i32
    %9 = vector.broadcast %c8_i32 : i32 to vector<16x128xi32>
    %10 = arith.cmpi eq, %8, %9 : vector<16x128xi32>
    %cst_7 = arith.constant -1.000000e+30 : f32
    %11 = vector.broadcast %cst_7 : f32 to vector<16x128xf32>
    %12 = arith.select %10, %11, %7 : vector<16x128xi1>, vector<16x128xf32>
    %cst_8 = arith.constant dense<0xFF800000> : vector<16xf32>
    %13 = vector.multi_reduction <maximumf>, %12, %cst_8 [1] : vector<16x128xf32> to vector<16xf32>
    %14 = vector.shape_cast %13 : vector<16xf32> to vector<16x1xf32>
    %15 = vector.broadcast %14 : vector<16x1xf32> to vector<16x128xf32>
    %16 = arith.subf %12, %15 : vector<16x128xf32>
    %17 = math.exp %16 : vector<16x128xf32>
    %cst_9 = arith.constant dense<0.000000e+00> : vector<16xf32>
    %18 = vector.multi_reduction <add>, %17, %cst_9 [1] : vector<16x128xf32> to vector<16xf32>
    %19 = vector.shape_cast %18 : vector<16xf32> to vector<16x1xf32>
    %20 = tpu.reciprocal %19 {approx = true} : vector<16x1xf32> -> vector<16x1xf32>
    %21 = vector.broadcast %20 : vector<16x1xf32> to vector<16x128xf32>
    %22 = arith.mulf %17, %21 : vector<16x128xf32>
    %23 = arith.select %10, %7, %22 : vector<16x128xi1>, vector<16x128xf32>
    %c0_10 = arith.constant 0 : index
    %c0_11 = arith.constant 0 : index
    %24 = vector.load %arg4[%c0_10, %c0_11] : memref<16x128xf32, #tpu.memory_space<vmem>>, vector<16x128xf32>
    tpu.vector_store %arg4[%c0_10, %c0_11], %23 {strides = array<i32>} : memref<16x128xf32, #tpu.memory_space<vmem>>, vector<16x128xf32>,
    return
  }
  func.func @transform_0(%arg0: i32) -> (i32, i32) {
    %c0_i32 = arith.constant 0 : i32
    %c0_i32_0 = arith.constant 0 : i32
    return %arg0, %c0_i32 : i32, i32
  }
  func.func @transform_1(%arg0: i32) -> (i32, i32) {
    %c0_i32 = arith.constant 0 : i32
    %c0_i32_0 = arith.constant 0 : i32
    %c0_i32_1 = arith.constant 0 : i32
    return %c0_i32, %c0_i32_0 : i32, i32
  }
  func.func @transform_2(%arg0: i32) -> (i32, i32) {
    %c0_i32 = arith.constant 0 : i32
    %c0_i32_0 = arith.constant 0 : i32
    %c0_i32_1 = arith.constant 0 : i32
    return %c0_i32, %c0_i32_0 : i32, i32
  }
  func.func @transform_3(%arg0: i32) -> (i32, i32) {
    %c0_i32 = arith.constant 0 : i32
    %c0_i32_0 = arith.constant 0 : i32
    return %arg0, %c0_i32 : i32, i32
  }
}

</mosaic_0001>

<bundles_post_ra>
// kernel: _forward_impl.1
= control target key start
LH: loop header
LB: loop body
LE: loop exit
PB: predicated region body
PF: predicated region fallthrough
CT: control target
= control target key end

     0   :  { %8 = vsyncpa [#allocation3], 0  ;;  %s514_s0 = inlined_call_operand.vmem [shape: bf16[16,128], index: 0, kind: input, shape index: {}]   ;;  %s515_s1 = inlined_call_operand.hbm [shape: bf16[128,128], index: 1, kind: input, shape index: {}]   ;;  %s516_s2 = inlined_call_operand.hbm [shape: bf16[128,128], index: 2, kind: input, shape index: {}]   ;;  %s517_s3 = inlined_call_operand.vmem [shape: f32[16,128], index: 3, kind: output, shape index: {}]  }
   0x1   :  { %9 = vsyncpa [#allocation5], 0  ;;  %s451_s12 = smov [#allocation2]   ;;  %s403_s16 = scalar_lea.hbm %s515_s1, 1024 }
   0x2   :  { %s17_s13 = sshll.u32 %s451_s12, 4  ;;  %p404_p0 = scmp.ne.s32.totalorder %s515_s1, %s403_s16  ;;  %s18_s13 = int_to_ptr.vmem [resolvable:$true] %s17_s13 }
   0x3   :  { %p407_p1 = scmp.lt.u32.totalorder %s403_s16, %s515_s1 }
   0x5   :  { %p409_p2 = pnand %p407_p1, %p404_p0 }
   0x7   :  { %412 = shalt.err (!%p409_p2)
}
   0x8   :  { %s413_s21 = scalar_lea.vmem %s18_s13, 1024  ;;  %p418_p4 = scmp.lt.s32.totalorder %s18_s13, %s18_s13 }
   0x9   :  { %p414_p3 = scmp.ne.s32.totalorder %s18_s13, %s413_s21  ;;  %p419_p5 = scmp.lt.s32.totalorder %s413_s21, %s413_s21 }
   0xb   :  { %p420_p6 = por %p419_p5, %p418_p4 }
   0xd   :  { %p421_p7 = pnand %p420_p6, %p414_p3 }
   0xf   :  { %424 = shalt.err (!%p421_p7)
}
  0x10   :  { %s452_s22 = smov 64   ;;  %s453_s23 = smov 4  }
  0x11   :  { %23 = dma.hbm_to_vmem [thread:$0]  %s515_s1, 1024, %s18_s13, [#allocation3], %s452_s22, %s452_s22, %s453_s23  }
  0x12   :  { %s454_s26 = smov [#allocation4]   ;;  %s425_s30 = scalar_lea.hbm %s516_s2, 1024 }
  0x13   :  { %s29_s27 = sshll.u32 %s454_s26, 4  ;;  %p426_p8 = scmp.ne.s32.totalorder %s516_s2, %s425_s30  ;;  %s30_s27 = int_to_ptr.vmem [resolvable:$true] %s29_s27 }
  0x14   :  { %p429_p9 = scmp.lt.u32.totalorder %s425_s30, %s516_s2 }
  0x16   :  { %p431_p10 = pnand %p429_p9, %p426_p8 }
  0x18   :  { %434 = shalt.err (!%p431_p10)
}
  0x19   :  { %s435_s8 = scalar_lea.vmem %s30_s27, 1024  ;;  %p440_p12 = scmp.lt.s32.totalorder %s30_s27, %s30_s27 }
  0x1a   :  { %p436_p11 = scmp.ne.s32.totalorder %s30_s27, %s435_s8  ;;  %p441_p13 = scmp.lt.s32.totalorder %s435_s8, %s435_s8 }
  0x1c   :  { %p442_p0 = por %p441_p13, %p440_p12 }
  0x1e   :  { %p443_p1 = pnand %p442_p0, %p436_p11 }
  0x20   :  { %446 = shalt.err (!%p443_p1)
}
  0x21   :  { %35 = dma.hbm_to_vmem [thread:$0]  %s516_s2, 1024, %s30_s27, [#allocation5], %s452_s22, %s452_s22, %s453_s23  }
  0x22   :  { %447 = dma.done.wait [#allocation3], 1024  }
  0x23   :  { %448 = vsyncadd [#allocation3], 4294966272 }
  0x24   :  { %449 = dma.done.wait [#allocation5], 1024  }
  0x25   :  { %450 = vsyncadd [#allocation5], 4294966272  ;;  %v455_v0 = vmov 0.0   ;;  %vm456_vm0 = vmmov 0   ;;  %v378_v1 = vld [vmem:[#allocation2] sm:$0xff]   ;;  %v379_v2 = vld [vmem:[#allocation2 + $0x8] sm:$0xff]   ;;  %v264_v25 = vlaneseq }
  0x26   :  { %332 = vmatprep.subr.bf16.mxu0 %v455_v0  ;;  %348 = vmatprep.mubr.msk.bf16.mxu0 %vm456_vm0, %v455_v0  ;;  %v380_v3 = vld [vmem:[#allocation2 + $0x10] sm:$0xff]   ;;  %v387_v4 = vld [vmem:[#allocation4] sm:$0xff]   ;;  %v381_v5 = vld [vmem:[#allocation2 + $0x18] sm:$0xff]  }
  0x27   :  { %352 = vmatprep.subr.bf16.mxu1 %v455_v0  ;;  %368 = vmatprep.mubr.msk.bf16.mxu1 %vm456_vm0, %v455_v0  ;;  %v388_v6 = vld [vmem:[#allocation4 + $0x8] sm:$0xff]   ;;  %v382_v7 = vld [vmem:[#allocation2 + $0x20] sm:$0xff]   ;;  %v389_v8 = vld [vmem:[#allocation4 + $0x10] sm:$0xff]   ;;  %v265_v26 = vand.u32 127, %v264_v25 }
  0x28   :  { %333 = vmatpush3.bf16.msra.mxu0 %v378_v1  ;;  %353 = vmatpush3.bf16.msra.mxu1 %v387_v4  ;;  %v383_v9 = vld [vmem:[#allocation2 + $0x28] sm:$0xff]   ;;  %v390_v10 = vld [vmem:[#allocation4 + $0x18] sm:$0xff]   ;;  %v384_v11 = vld [vmem:[#allocation2 + $0x30] sm:$0xff]  }
  0x29   :  { %334 = vmatprep.subr.bf16.mxu0 %v455_v0  ;;  %354 = vmatprep.subr.bf16.mxu1 %v455_v0  ;;  %v391_v12 = vld [vmem:[#allocation4 + $0x20] sm:$0xff]   ;;  %v385_v13 = vld [vmem:[#allocation2 + $0x38] sm:$0xff]   ;;  %v392_v14 = vld [vmem:[#allocation4 + $0x28] sm:$0xff]   ;;  %vm266_vm1 = vcmp.eq.s32.totalorder %v265_v26, 8 }
  0x2a   :  { %v386_v15 = vld [vmem:[%s514_s0] sm:$0xff]   ;;  %v394_v17 = vld [vmem:[#allocation4 + $0x38] sm:$0xff]  }
  0x2b   :  { %v393_v16 = vld [vmem:[#allocation4 + $0x30] sm:$0xff]  }
  0x2c   :  { %335 = vmatpush3.bf16.msra.mxu0 %v379_v2  ;;  %355 = vmatpush3.bf16.msra.mxu1 %v388_v6 }
  0x2d   :  { %336 = vmatprep.subr.bf16.mxu0 %v455_v0  ;;  %356 = vmatprep.subr.bf16.mxu1 %v455_v0 }
  0x30   :  { %337 = vmatpush3.bf16.msra.mxu0 %v380_v3  ;;  %357 = vmatpush3.bf16.msra.mxu1 %v389_v8 }
  0x31   :  { %338 = vmatprep.subr.bf16.mxu0 %v455_v0  ;;  %358 = vmatprep.subr.bf16.mxu1 %v455_v0 }
  0x34   :  { %339 = vmatpush3.bf16.msra.mxu0 %v381_v5  ;;  %359 = vmatpush3.bf16.msra.mxu1 %v390_v10 }
  0x35   :  { %340 = vmatprep.subr.bf16.mxu0 %v455_v0  ;;  %360 = vmatprep.subr.bf16.mxu1 %v455_v0 }
  0x38   :  { %341 = vmatpush3.bf16.msra.mxu0 %v382_v7  ;;  %361 = vmatpush3.bf16.msra.mxu1 %v391_v12 }
  0x39   :  { %342 = vmatprep.subr.bf16.mxu0 %v455_v0  ;;  %362 = vmatprep.subr.bf16.mxu1 %v455_v0 }
  0x3c   :  { %343 = vmatpush3.bf16.msra.mxu0 %v383_v9  ;;  %363 = vmatpush3.bf16.msra.mxu1 %v392_v14 }
  0x3d   :  { %344 = vmatprep.subr.bf16.mxu0 %v455_v0  ;;  %364 = vmatprep.subr.bf16.mxu1 %v455_v0 }
  0x40   :  { %345 = vmatpush3.bf16.msra.mxu0 %v384_v11  ;;  %365 = vmatpush3.bf16.msra.mxu1 %v393_v16 }
  0x41   :  { %346 = vmatprep.subr.bf16.mxu0 %v455_v0  ;;  %366 = vmatprep.subr.bf16.mxu1 %v455_v0 }
  0x44   :  { %347 = vmatpush3.bf16.msra.mxu0 %v385_v13  ;;  %367 = vmatpush3.bf16.msra.mxu1 %v394_v17 }
  0x47   :  { %349 = vmatmul.mubr.bf16.vlgmr.msra.gmra.mrb[0].mxu0 %v386_v15 }
 0x11a   :  { %v149_v18 = vpop.f32.mrb[0].mxu0 }
 0x11b   :  { %v350_v19 = vpop.f32.mrb[1].mxu0  ;;  %v156_v21 = vmax.f32 %v149_v18, 0.0 }
 0x11c   :  { %v152_v20 = vpop.f32.mrb[2].mxu0 }
 0x11d   :  { %v157_v22 = vmax.f32 %v152_v20, 0.0  ;;  %v351_v23 = vpop.f32.mrb[3].mxu0 }
 0x11f   :  { %v158_v24 = vpack.c.bf16 %v157_v22, %v156_v21 }
 0x121   :  { %369 = vmatmul.mubr.bf16.vlgmr.msra.gmra.mrb[0].mxu1 %v158_v24 }
 0x1f4   :  { %v257_v27 = vpop.f32.mrb[0].mxu1 }
 0x1f5   :  { %v370_v28 = vpop.f32.mrb[1].mxu1  ;;  %v267_v29 = vsel %vm266_vm1, -1e+30, %v257_v27 }
 0x1f6   :  { %269 = vmax.xlane.f32.xlu0 %v267_v29  ;;  %v260_v30 = vpop.f32.mrb[2].mxu1 }
 0x1f7   :  { %v371_v31 = vpop.f32.mrb[3].mxu1  ;;  %v268_v32 = vsel %vm266_vm1, -1e+30, %v260_v30 }
 0x1fa   :  { %271 = vmax.xlane.f32.xlu0 %v268_v32 }
 0x283   :  { %v270_v33 = vpop.xlane.xlu0 %269 }
 0x284   :  { %v273_v34 = vsub.f32 %v267_v29, %v270_v33 }
 0x286   :  { %v275_v35 = vmul.f32 1.442695, %v273_v34 }
 0x287   :  { %v272_v36 = vpop.xlane.xlu0 %271 }
 0x288   :  { %395 = vpow2.f32 %v275_v35  ;;  %v274_v37 = vsub.f32 %v268_v32, %v272_v36 }
 0x28a   :  { %v277_v38 = vmul.f32 1.442695, %v274_v37 }
 0x28c   :  { %397 = vpow2.f32 %v277_v38 }
 0x292   :  { %v396_v39 = vpop.eup %395 }
 0x293   :  { %279 = vadd.xlane.f32.xlu1 %v396_v39 }
 0x296   :  { %v398_v40 = vpop.eup %397 }
 0x297   :  { %281 = vadd.xlane.f32.xlu1 %v398_v40 }
 0x320   :  { %v280_v41 = vpop.xlane.xlu1 %279 }
 0x321   :  { %399 = vrcp.f32 %v280_v41 }
 0x324   :  { %v282_v42 = vpop.xlane.xlu1 %281 }
 0x325   :  { %401 = vrcp.f32 %v282_v42 }
 0x32b   :  { %v400_v43 = vpop.eup %399 }
 0x32c   :  { %v285_v44 = vmul.f32 %v400_v43, %v396_v39 }
 0x32e   :  { %v287_v45 = vsel %vm266_vm1, %v257_v27, %v285_v44 }
 0x32f   :  { %v402_v46 = vpop.eup %401  ;;  %289 = vst [vmem:[%s517_s3] sm:$0xff] %v287_v45 }
 0x330   :  { %v286_v47 = vmul.f32 %v402_v46, %v398_v40 }
 0x332   :  { %v288_v48 = vsel %vm266_vm1, %v260_v30, %v286_v47 }
 0x333   :  { %290 = vst [vmem:[%s517_s3 + $0x8] sm:$0xff] %v288_v48 }
 0x334   :  { %295 = vsyncpa [#allocation3], 1 }
 0x335   :  { %296 = vsyncpa [#allocation5], 1 }

</bundles_post_ra>
